<compile_context>
chip_gen: v6e
topology: v6e:2x2x1
jax: 0.10.0
libtpu: 0.0.40
codegen_flags: <defaults>
</compile_context>

<pallas_src>
import jax
import jax.numpy as jnp
from jax import lax
from jax.experimental import pallas as pl
from jax.experimental.pallas import tpu as pltpu

BETA = 0.1
LANES = 128
SUBLANES = 8


def _neg_logsigmoid(x):
    # Numerically stable -logsigmoid(x) = max(-x, 0) + log1p(exp(-|x|)).
    # exp/log1p go to the EUP (free slot while the kernel is HBM-bound).
    return jnp.maximum(-x, 0.0) + jnp.log1p(jnp.exp(-jnp.abs(x)))


def _make_dpo_kernel(beta, chunk_rows, num_chunks, unroll):
    """Kernel closed over static config. Each grid step reduces one
    (tile_rows, 128) tile of the four inputs into an (8, 128) f32 partial."""
    beta = float(beta)

    def kernel(pc_ref, pr_ref, rc_ref, rr_ref, out_ref):
        folds = chunk_rows // SUBLANES

        def chunk_partial(r0):
            # Stream one (chunk_rows, 128) sub-chunk per input, upcast to f32.
            pc = pc_ref[pl.ds(r0, chunk_rows), :].astype(jnp.float32)
            pr = pr_ref[pl.ds(r0, chunk_rows), :].astype(jnp.float32)
            rc = rc_ref[pl.ds(r0, chunk_rows), :].astype(jnp.float32)
            rr = rr_ref[pl.ds(r0, chunk_rows), :].astype(jnp.float32)
            logits = beta * ((pc - pr) - (rc - rr))
            nl = _neg_logsigmoid(logits)
            # Contiguous, tile-aligned (chunk,128)->(folds,8,128) fold; the
            # axis-0 sum is a short chain of whole-vreg VPU adds (no XLU).
            return jnp.sum(nl.reshape(folds, SUBLANES, LANES), axis=0)

        if num_chunks == 1:
            out_ref[...] = chunk_partial(0)
        else:
            def body(c, acc):
                r0 = pl.multiple_of(c * chunk_rows, chunk_rows)
                return acc + chunk_partial(r0)

            acc = lax.fori_loop(0, num_chunks, body,
                                jnp.zeros((SUBLANES, LANES), jnp.float32),
                                unroll=unroll)
            out_ref[...] = acc

    return kernel


def _choose_tiling(rows, max_tile_rows):
    """Pick (tile_rows, chunk_rows, num_tiles). tile_rows % chunk_rows == 0,
    chunk_rows % 8 == 0, and num_tiles >= 2 whenever rows >= 16 (v7x)."""
    if rows < 2 * SUBLANES:
        if rows >= SUBLANES:
            return SUBLANES, SUBLANES, 1
        return 0, 0, 0          # too small for the kernel; plain jnp handles it
    tile_rows = min(max_tile_rows, rows // 2)   # >= 2 tiles
    if tile_rows >= 64:
        tile_rows -= tile_rows % 64
        chunk_rows = 64          # 64x128 f32 chunk = 8 vregs per input
    else:
        tile_rows -= tile_rows % SUBLANES
        chunk_rows = tile_rows
    return tile_rows, chunk_rows, rows // tile_rows


def dpo_loss(policy_chosen_logps, policy_rejected_logps,
             reference_chosen_logps, reference_rejected_logps,
             beta=BETA, max_tile_rows=None):
    """Pallas implementation of DPOLoss.forward. Returns a scalar f32 loss.

    bf16 inputs are the preferred fast path (halves HBM bytes); the kernel
    upcasts and accumulates in f32.
    """

    def prep(x):
        x = jnp.asarray(x)
        if x.dtype != jnp.float32 and x.dtype != jnp.bfloat16:
            x = x.astype(jnp.float32)
        return x.reshape(-1)

    pc, pr, rc, rr = map(prep, (policy_chosen_logps, policy_rejected_logps,
                                reference_chosen_logps, reference_rejected_logps))
    n = pc.shape[0]
    if n == 0:
        return jnp.float32(jnp.nan)   # torch .mean() over empty -> NaN

    itemsize = max(x.dtype.itemsize for x in (pc, pr, rc, rr))
    if max_tile_rows is None:
        # ~32 MiB of double-buffered inputs at the default: fits every gen.
        max_tile_rows = 16384 if itemsize == 2 else 8192
    # Never let double-buffered inputs exceed ~48 MiB (v7x has 64 MiB VMEM).
    max_tile_rows = max(SUBLANES,
                        min(int(max_tile_rows), (48 << 20) // (8 * LANES * itemsize)))

    rows = n // LANES
    tile_rows, chunk_rows, num_tiles = _choose_tiling(rows, max_tile_rows)
    split = num_tiles * tile_rows * LANES       # elements covered by the kernel

    total = jnp.float32(0.0)

    if num_tiles > 0:
        if n % LANES == 0:
            # Zero-copy: reshape of the full contiguous 1-D array is a bitcast.
            slabs = [x.reshape(rows, LANES) for x in (pc, pr, rc, rr)]
        else:
            # n not 128-aligned: a lane-dense 2-D view of the bulk needs one
            # slice copy (reads+writes `split` elems per input).  Prefer
            # 128-aligned batch sizes to stay on the zero-copy path.
            slabs = [x[:split].reshape(split // LANES, LANES)
                     for x in (pc, pr, rc, rr)]

        num_chunks = tile_rows // chunk_rows
        unroll = 4 if num_chunks >= 4 else True
        kernel = _make_dpo_kernel(beta, chunk_rows, num_chunks, unroll)

        tile_in_bytes = tile_rows * LANES * itemsize
        # 4 inputs x 2 pipeline buffers + small output/headroom.
        vmem_limit = min(4 * 2 * tile_in_bytes + (4 << 20), 64 << 20)

        partials = pl.pallas_call(
            kernel,
            out_shape=jax.ShapeDtypeStruct((num_tiles * SUBLANES, LANES),
                                           jnp.float32),
            grid_spec=pltpu.PrefetchScalarGridSpec(
                num_scalar_prefetch=0,
                grid=(num_tiles,),
                in_specs=[pl.BlockSpec((tile_rows, LANES), lambda i: (i, 0))
                          for _ in range(4)],
                out_specs=pl.BlockSpec((SUBLANES, LANES), lambda i: (i, 0)),
            ),
            compiler_params=pltpu.CompilerParams(
                dimension_semantics=("parallel",),
                vmem_limit_bytes=int(vmem_limit)),
        )(*slabs)
        total = total + jnp.sum(partials)

    if split < n:
        # Ragged tail (< tile_rows*128 elements): fused jnp reads it straight
        # from the 1-D inputs (no materialized pad/copy).
        t_pc, t_pr, t_rc, t_rr = (x[split:].astype(jnp.float32)
                                  for x in (pc, pr, rc, rr))
        t_logits = float(beta) * ((t_pc - t_pr) - (t_rc - t_rr))
        total = total + jnp.sum(_neg_logsigmoid(t_logits))

    return total / n


def dpo_loss_ref(pc, pr, rc, rr, beta=BETA):
    logits = beta * ((pc - pr) - (rc - rr))
    return jnp.mean(-jax.nn.log_sigmoid(logits))


if __name__ == "__main__":
    key = jax.random.PRNGKey(0)
    k1, k2, k3, k4 = jax.random.split(key, 4)

    # Small DPO batch, deliberately NOT a multiple of 128 so both the
    # multi-tile kernel path and the ragged-tail jnp path are exercised.
    B = 2200
    policy_chosen = jax.random.normal(k1, (B,), jnp.float32) - 1.0
    policy_rejected = jax.random.normal(k2, (B,), jnp.float32) - 2.0
    reference_chosen = jax.random.normal(k3, (B,), jnp.float32) - 1.0
    reference_rejected = jax.random.normal(k4, (B,), jnp.float32) - 2.0

    loss_fn = jax.jit(dpo_loss)
    loss = loss_fn(policy_chosen, policy_rejected,
                   reference_chosen, reference_rejected)
    jax.block_until_ready(loss)
    ref = dpo_loss_ref(policy_chosen, policy_rejected,
                       reference_chosen, reference_rejected)
    assert jnp.allclose(loss, ref, rtol=1e-5, atol=1e-6), (loss, ref)

    # bf16, 128-aligned batch: the zero-copy fast path (no pad / no slice).
    B2 = 4096
    pc2 = (jax.random.normal(k1, (B2,), jnp.float32) - 1.0).astype(jnp.bfloat16)
    pr2 = (jax.random.normal(k2, (B2,), jnp.float32) - 2.0).astype(jnp.bfloat16)
    rc2 = (jax.random.normal(k3, (B2,), jnp.float32) - 1.0).astype(jnp.bfloat16)
    rr2 = (jax.random.normal(k4, (B2,), jnp.float32) - 2.0).astype(jnp.bfloat16)
    loss_bf16 = jax.jit(dpo_loss)(pc2, pr2, rc2, rr2)
    jax.block_until_ready(loss_bf16)
    ref_bf16 = dpo_loss_ref(pc2.astype(jnp.float32), pr2.astype(jnp.float32),
                            rc2.astype(jnp.float32), rr2.astype(jnp.float32))
    assert jnp.allclose(loss_bf16, ref_bf16, rtol=1e-5, atol=1e-6), (loss_bf16, ref_bf16)

    print("KERNEL_OK")
</pallas_src>

<mosaic_0001>
module attributes {stable_mosaic.version = 11 : i64} {
  func.func @kernel(%arg0: i32, %arg1: memref<8x128xf32, #tpu.memory_space<vmem>>, %arg2: memref<8x128xf32, #tpu.memory_space<vmem>>, %arg3: memref<8x128xf32, #tpu.memory_space<vmem>>, %arg4: memref<8x128xf32, #tpu.memory_space<vmem>>, %arg5: memref<8x128xf32, #tpu.memory_space<vmem>>) attributes {dimension_semantics = [#tpu.dimension_semantics<parallel>], iteration_bounds = array<i64: 2>, scalar_prefetch = 0 : i64, scratch_operands = 0 : i64, tpu.core_type = #tpu.core_type<tc>, window_params = [{transform_indices = @transform_0, window_bounds = array<i64: 8, 128>}, {transform_indices = @transform_1, window_bounds = array<i64: 8, 128>}, {transform_indices = @transform_2, window_bounds = array<i64: 8, 128>}, {transform_indices = @transform_3, window_bounds = array<i64: 8, 128>}, {transform_indices = @transform_4, window_bounds = array<i64: 8, 128>}]} {
    %c0 = arith.constant 0 : index
    %c0_0 = arith.constant 0 : index
    %0 = vector.load %arg1[%c0, %c0_0] : memref<8x128xf32, #tpu.memory_space<vmem>>, vector<8x128xf32>
    %c0_1 = arith.constant 0 : index
    %c0_2 = arith.constant 0 : index
    %1 = vector.load %arg2[%c0_1, %c0_2] : memref<8x128xf32, #tpu.memory_space<vmem>>, vector<8x128xf32>
    %c0_3 = arith.constant 0 : index
    %c0_4 = arith.constant 0 : index
    %2 = vector.load %arg3[%c0_3, %c0_4] : memref<8x128xf32, #tpu.memory_space<vmem>>, vector<8x128xf32>
    %c0_5 = arith.constant 0 : index
    %c0_6 = arith.constant 0 : index
    %3 = vector.load %arg4[%c0_5, %c0_6] : memref<8x128xf32, #tpu.memory_space<vmem>>, vector<8x128xf32>
    %4 = arith.subf %0, %1 : vector<8x128xf32>
    %5 = arith.subf %2, %3 : vector<8x128xf32>
    %6 = arith.subf %4, %5 : vector<8x128xf32>
    %cst = arith.constant 1.000000e-01 : f32
    %7 = vector.broadcast %cst : f32 to vector<8x128xf32>
    %8 = arith.mulf %7, %6 : vector<8x128xf32>
    %cst_7 = arith.constant 0.000000e+00 : f32
    %9 = vector.broadcast %cst_7 : f32 to vector<8x128xf32>
    %10 = arith.subf %9, %8 : vector<8x128xf32>
    %cst_8 = arith.constant 0.000000e+00 : f32
    %11 = vector.broadcast %cst_8 : f32 to vector<8x128xf32>
    %12 = arith.maximumf %10, %11 : vector<8x128xf32>
    %13 = math.absf %8 : vector<8x128xf32>
    %cst_9 = arith.constant 0.000000e+00 : f32
    %14 = vector.broadcast %cst_9 : f32 to vector<8x128xf32>
    %15 = arith.subf %14, %13 : vector<8x128xf32>
    %16 = math.exp %15 : vector<8x128xf32>
    %17 = math.log1p %16 : vector<8x128xf32>
    %18 = arith.addf %12, %17 : vector<8x128xf32>
    %19 = vector.shape_cast %18 : vector<8x128xf32> to vector<1x8x128xf32>
    %cst_10 = arith.constant dense<0.000000e+00> : vector<8x128xf32>
    %20 = vector.multi_reduction <add>, %19, %cst_10 [0] : vector<1x8x128xf32> to vector<8x128xf32>
    %c0_11 = arith.constant 0 : index
    %c0_12 = arith.constant 0 : index
    %21 = vector.load %arg5[%c0_11, %c0_12] : memref<8x128xf32, #tpu.memory_space<vmem>>, vector<8x128xf32>
    tpu.vector_store %arg5[%c0_11, %c0_12], %20 {strides = array<i32>} : memref<8x128xf32, #tpu.memory_space<vmem>>, vector<8x128xf32>,
    return
  }
  func.func @transform_0(%arg0: i32) -> (i32, i32) {
    %c0_i32 = arith.constant 0 : i32
    %c0_i32_0 = arith.constant 0 : i32
    return %arg0, %c0_i32 : i32, i32
  }
  func.func @transform_1(%arg0: i32) -> (i32, i32) {
    %c0_i32 = arith.constant 0 : i32
    %c0_i32_0 = arith.constant 0 : i32
    return %arg0, %c0_i32 : i32, i32
  }
  func.func @transform_2(%arg0: i32) -> (i32, i32) {
    %c0_i32 = arith.constant 0 : i32
    %c0_i32_0 = arith.constant 0 : i32
    return %arg0, %c0_i32 : i32, i32
  }
  func.func @transform_3(%arg0: i32) -> (i32, i32) {
    %c0_i32 = arith.constant 0 : i32
    %c0_i32_0 = arith.constant 0 : i32
    return %arg0, %c0_i32 : i32, i32
  }
  func.func @transform_4(%arg0: i32) -> (i32, i32) {
    %c0_i32 = arith.constant 0 : i32
    %c0_i32_0 = arith.constant 0 : i32
    return %arg0, %c0_i32 : i32, i32
  }
}

</mosaic_0001>

<bundles_post_ra>
// kernel: dpo_loss.1
= control target key start
LH: loop header
LB: loop body
LE: loop exit
PB: predicated region body
PF: predicated region fallthrough
CT: control target
= control target key end

     0   :  { %s416_s15 = smov 0   ;;  %s449_s0 = inlined_call_operand.vmem [shape: f32[16,128], index: 0, kind: input, shape index: {}]   ;;  %s450_s1 = inlined_call_operand.vmem [shape: f32[16,128], index: 1, kind: input, shape index: {}]   ;;  %s451_s2 = inlined_call_operand.vmem [shape: f32[16,128], index: 2, kind: input, shape index: {}]   ;;  %s452_s3 = inlined_call_operand.vmem [shape: f32[16,128], index: 3, kind: input, shape index: {}]   ;;  %s453_s4 = inlined_call_operand.vmem [shape: f32[16,128], index: 4, kind: output, shape index: {}]  }
   0x1 LB: > { %s359_s16 = sadd.s32 4294967295, %s389_s15   ;;  %p363_p0 = scmp.ge.s32.totalorder %s389_s15, 1  ;;  %s389_s15 = sphi %s416_s15, %s14_s15  }
   0x2   : > { %p188_p1 = scmp.lt.s32.totalorder %s389_s15, 3 }
   0x4   : > { %p189_p2 = pnand %p363_p0, %p188_p1 }
   0x5   : > { %p224_p3 = scmp.lt.s32.totalorder (!%p189_p2), %s359_s16, 1 }
   0x6   : > { %192 = sbr.rel (%p189_p2) target bundleno = 66 (0x42), region = 36 }
   0xb   : > { %s455_s16 = smov (!%p224_p3, %s359_s16), 1 }
   0xc   : > { %s424_s17 = sshll.u32 %s455_s16, 3 }
   0xd   : > { %s227_s20 = scalar_lea.vmem %s449_s0, %s424_s17  ;;  %s231_s23 = scalar_lea.vmem %s450_s1, %s424_s17 }
   0xe   : > { %s235_s26 = scalar_lea.vmem %s451_s2, %s424_s17  ;;  %s239_s29 = scalar_lea.vmem %s452_s3, %s424_s17  ;;  %v244_v0 = vld [vmem:[%s227_s20] sm:$0xff] }
   0xf   : > { %v245_v1 = vld [vmem:[%s231_s23] sm:$0xff]  ;;  %s243_s6 = scalar_lea.vmem %s453_s4, %s424_s17 }
  0x10   : > { %v246_v2 = vld [vmem:[%s235_s26] sm:$0xff]  ;;  %v248_v4 = vsub.f32 %v244_v0, %v245_v1 }
  0x11   : > { %v247_v3 = vld [vmem:[%s239_s29] sm:$0xff] }
  0x12   : > { %v249_v5 = vsub.f32 %v246_v2, %v247_v3 }
  0x14   : > { %v250_v6 = vsub.f32 %v248_v4, %v249_v5 }
  0x16   : > { %v251_v7 = vmul.f32 0.1, %v250_v6 }
  0x18   : > { %v254_v8 = vand.u32 2147483647, %v251_v7  ;;  %v252_v15 = vsub.f32 0.0, %v251_v7 }
  0x1a   : > { %v255_v9 = vsub.f32 0.0, %v254_v8  ;;  %v253_v19 = vmax.f32 %v252_v15, 0.0 }
  0x1c   : > { %v256_v10 = vmul.f32 1.442695, %v255_v9 }
  0x1e   : > { %379 = vpow2.f32 %v256_v10 }
  0x2b   : > { %v380_v11 = vpop.eup %379 }
  0x2c   : > { %v258_v12 = vadd.f32 1.0, %v380_v11  ;;  %v261_v13 = vmul.f32 -0.5, %v380_v11  ;;  %v264_v16 = vand.u32 2147483647, %v380_v11 }
  0x2e   : > { %381 = vlog2.f32 %v258_v12  ;;  %v262_v14 = vadd.f32 1.0, %v261_v13  ;;  %vm265_vm0 = vcmp.lt.f32.partialorder %v264_v16, 0.0004427343 }
  0x30   : > { %v263_v17 = vmul.f32 %v380_v11, %v262_v14 }
  0x3b   : > { %v382_v18 = vpop.eup %381 }
  0x3c   : > { %v260_v20 = vmul.f32 0.6931472, %v382_v18 }
  0x3e   : > { %v266_v21 = vsel %vm265_vm0, %v263_v17, %v260_v20 }
  0x3f   : > { %v267_v22 = vadd.f32 %v266_v21, %v253_v19 }
  0x41   : > { %269 = vst [vmem:[%s243_s6] sm:$0xff] %v267_v22 }
  0x42 PF: > { %s14_s15 = sadd.s32 1, %s389_s15  }
  0x43   : > { %p11_p4 = scmp.ge.s32.totalorder %s14_s15, 4  }
  0x45   :  { %13 = sbr.rel (!%p11_p4) target bundleno = 1 (0x1), region = 75 }

</bundles_post_ra>
